<compile_context>
chip_gen: v5e
topology: v5e:2x2
jax: 0.10.0
libtpu: 0.0.40
codegen_flags: <defaults>
</compile_context>

<pallas_src>
import functools

import numpy as np
import jax
import jax.numpy as jnp
from jax.experimental import pallas as pl
from jax.experimental.pallas import tpu as pltpu

_INV_LN10 = 1.0 / float(np.log(10.0))
_INV_LN2 = 1.0 / float(np.log(2.0))


def _round_up(x, m):
    return ((x + m - 1) // m) * m


# ----------------------------------------------------------------------------
# Deterministic parameter construction (librosa-style slaney mel filterbank,
# torch-style periodic Hann window, windowed real-DFT basis).
# ----------------------------------------------------------------------------
def _hz_to_mel(f):
    f = np.asarray(f, dtype=np.float64)
    f_sp = 200.0 / 3.0
    mels = f / f_sp
    min_log_hz = 1000.0
    min_log_mel = min_log_hz / f_sp
    logstep = np.log(6.4) / 27.0
    return np.where(
        f >= min_log_hz,
        min_log_mel + np.log(np.maximum(f, min_log_hz) / min_log_hz) / logstep,
        mels,
    )


def _mel_to_hz(m):
    m = np.asarray(m, dtype=np.float64)
    f_sp = 200.0 / 3.0
    freqs = f_sp * m
    min_log_hz = 1000.0
    min_log_mel = min_log_hz / f_sp
    logstep = np.log(6.4) / 27.0
    return np.where(
        m >= min_log_mel,
        min_log_hz * np.exp(logstep * (m - min_log_mel)),
        freqs,
    )


def mel_filterbank(sr, n_fft, n_mels, fmin, fmax):
    """Slaney-normalized triangular mel filterbank, shape (n_mels, 1 + n_fft//2)."""
    fftfreqs = np.linspace(0.0, sr / 2.0, 1 + n_fft // 2)
    mel_pts = _mel_to_hz(np.linspace(_hz_to_mel(fmin), _hz_to_mel(fmax), n_mels + 2))
    fdiff = np.diff(mel_pts)
    ramps = mel_pts[:, None] - fftfreqs[None, :]
    lower = -ramps[:-2] / fdiff[:-1, None]
    upper = ramps[2:] / fdiff[1:, None]
    weights = np.maximum(0.0, np.minimum(lower, upper))
    enorm = 2.0 / (mel_pts[2: n_mels + 2] - mel_pts[:n_mels])
    weights = weights * enorm[:, None]
    return weights.astype(np.float32)


def hann_window_periodic(n):
    # torch.hann_window(n) (periodic)
    i = np.arange(n, dtype=np.float64)
    return 0.5 * (1.0 - np.cos(2.0 * np.pi * i / n))


# ----------------------------------------------------------------------------
# Hardware detection (conservative fallbacks).
# ----------------------------------------------------------------------------
def _detect_tpu():
    """Return (physical per-core VMEM bytes, default row-tile size)."""
    vmem = None
    try:
        vmem = int(getattr(pltpu.get_tpu_info(), "vmem_capacity_bytes"))
    except Exception:
        vmem = None
    try:
        kind = jax.devices()[0].device_kind.lower()
    except Exception:
        kind = ""
    base_tm = 256
    if ("v5e" in kind) or ("v5 lite" in kind) or ("v5litepod" in kind):
        base_tm = 128                       # v5e roofline already covered at 2*128 FLOP/byte
        vmem = vmem or (128 << 20)
    elif ("v6" in kind) or ("v5" in kind) or ("v4" in kind):
        vmem = vmem or (128 << 20)
    else:
        vmem = vmem or (64 << 20)           # v7x / unknown: conservative 64 MiB per core
    return vmem, base_tm


def _choose_freq_tiling(n_freq, fft_size, vmem_cap):
    """Pick (tile_f, n_ft).  tile_f is a multiple of 128; f_pad = tile_f*n_ft >= n_freq,
    with minimal slack subject to the interleaved-basis VMEM footprint."""
    f128 = _round_up(n_freq, 128)
    nb = f128 // 128
    single_bytes = fft_size * (2 * f128) * 2            # interleaved [cos|sin], bf16
    if single_bytes <= vmem_cap // 3:
        return f128, 1                                   # resident, single-buffered
    stream_cap = (2 * vmem_cap) // 5                     # both pipeline buffers together
    for n_ft in range(2, nb + 1):
        tile_f = 128 * (-(-nb // n_ft))
        if 2 * fft_size * (2 * tile_f) * 2 <= stream_cap:
            return tile_f, n_ft
    return 128, nb


def _pick_tile_m(bf, default_tile_m):
    """Row-tile size: multiple of 16, at most default, and >=2 row tiles when possible
    (keeps both v7x TensorCores busy and limits zero-row padding)."""
    if bf <= 16:
        return 16
    n_rt = max(2, -(-bf // default_tile_m))
    return max(16, min(_round_up(-(-bf // n_rt), 16), default_tile_m))


def build_resolution(fs, fft_size, hop_size, win_length, num_mels, fmin, fmax, vmem_cap):
    """Precompute bf16 constants for one resolution."""
    n_freq = fft_size // 2 + 1
    tile_f, n_ft = _choose_freq_tiling(n_freq, fft_size, vmem_cap)
    f_pad = tile_f * n_ft
    m_pad = _round_up(num_mels, 128)

    # torch.stft centers a shorter window inside n_fft.
    w = hann_window_periodic(win_length)
    if win_length < fft_size:
        wf = np.zeros(fft_size, np.float64)
        lp = (fft_size - win_length) // 2
        wf[lp: lp + win_length] = w
    else:
        assert win_length == fft_size
        wf = w

    n = np.arange(fft_size, dtype=np.float64)[:, None]
    f = np.arange(n_freq, dtype=np.float64)[None, :]
    ang = 2.0 * np.pi * n * f / fft_size
    cos_p = np.zeros((fft_size, f_pad), np.float32)
    sin_p = np.zeros((fft_size, f_pad), np.float32)
    cos_p[:, :n_freq] = (wf[:, None] * np.cos(ang)).astype(np.float32)
    sin_p[:, :n_freq] = (wf[:, None] * np.sin(ang)).astype(np.float32)

    # Interleaved per-freq-tile layout: block j = [cos_j | sin_j] (each tile_f wide).
    cs = np.zeros((fft_size, 2 * f_pad), np.float32)
    for jt in range(n_ft):
        cs[:, 2 * jt * tile_f: 2 * jt * tile_f + tile_f] = cos_p[:, jt * tile_f:(jt + 1) * tile_f]
        cs[:, 2 * jt * tile_f + tile_f: 2 * (jt + 1) * tile_f] = sin_p[:, jt * tile_f:(jt + 1) * tile_f]

    mel = mel_filterbank(fs, fft_size, num_mels, fmin, fmax)   # (n_mels, n_freq)
    mel_p = np.zeros((f_pad, m_pad), np.float32)
    mel_p[:n_freq, :num_mels] = mel.T

    return {
        "fft": fft_size,
        "hop": hop_size,
        "tile_f": tile_f,
        "n_ft": n_ft,
        "m_pad": m_pad,
        "cossin": jnp.asarray(cs, jnp.bfloat16),
        "mel": jnp.asarray(mel_p, jnp.bfloat16),
        # plain (non-interleaved) copies for the pure-JAX reference path
        "cos_ref": jnp.asarray(cos_p, jnp.bfloat16),
        "sin_ref": jnp.asarray(sin_p, jnp.bfloat16),
    }


# ----------------------------------------------------------------------------
# Pallas kernel.
#   grid = (row_tiles [parallel], freq_tiles [arbitrary])
#   refs: fh (tile_m, fft) bf16, fy (tile_m, fft) bf16,
#         cossin (fft, 2*tile_f) bf16, mel (tile_f, m_pad) bf16,
#         out (1, 8, m_pad) f32,
#         scratch: acc_h (tile_m, m_pad) f32, acc_y (tile_m, m_pad) f32
# ----------------------------------------------------------------------------
def _mel_l1_kernel(fh_ref, fy_ref, cs_ref, mel_ref, out_ref, acch_ref, accy_ref, *, eps):
    j = pl.program_id(1)
    tile_f = cs_ref.shape[1] // 2

    @pl.when(j == 0)
    def _():
        acch_ref[...] = jnp.zeros_like(acch_ref)
        accy_ref[...] = jnp.zeros_like(accy_ref)

    def accumulate(frames, acc_ref):
        reim = jnp.dot(frames, cs_ref[...],                    # bf16 x bf16 -> f32 (MXU)
                       preferred_element_type=jnp.float32)     # (tile_m, 2*tile_f)
        re = reim[:, :tile_f]
        im = reim[:, tile_f:]
        amp = jnp.sqrt(jnp.maximum(re * re + im * im, eps))
        acc_ref[...] += jnp.dot(amp.astype(jnp.bfloat16), mel_ref[...],
                                preferred_element_type=jnp.float32)

    accumulate(fh_ref[...], acch_ref)
    accumulate(fy_ref[...], accy_ref)

    @pl.when(j == pl.num_programs(1) - 1)
    def _():
        lm_h = jnp.log(jnp.maximum(acch_ref[...], eps))        # base-e; 1/ln(base) outside
        lm_y = jnp.log(jnp.maximum(accy_ref[...], eps))
        diff = jnp.abs(lm_h - lm_y)                            # (tile_m, m_pad)
        tm, mp = diff.shape
        # Lane-dense per-lane partial sums; no cross-lane reduction in the kernel.
        out_ref[...] = jnp.sum(diff.reshape(tm // 8, 8, mp), axis=0)[None, :, :]


def _vmem_budget(tile_m, n_fft, tile_f, n_ft, m_pad, vmem_cap):
    if n_ft == 1:
        cs_b = n_fft * (2 * tile_f) * 2            # resident, single-buffered, bf16
        mel_b = tile_f * m_pad * 2
    else:
        cs_b = 2 * n_fft * (2 * tile_f) * 2        # streamed, double-buffered, bf16
        mel_b = 2 * tile_f * m_pad * 2
    b = 2 * 2 * tile_m * n_fft * 2                 # fh + fy LHS tiles, double-buffered, bf16
    b += cs_b + mel_b
    b += 2 * tile_m * m_pad * 4                    # two f32 accumulators
    b += 2 * 8 * m_pad * 4                         # output blocks
    b += tile_m * (2 * tile_f) * 4 * 7 // 2        # reim / power / amp temporaries (~3.5x f32)
    b = int(b * 1.15) + (2 << 20)
    cap = int(vmem_cap * 0.82)                     # leave headroom for Mosaic internals
    return int(max(24 << 20, min(b, cap)))


def mel_l1_sum(frames_hat, frames_y, cossin, melmat, tile_f, n_ft, eps, tile_m, vmem_cap):
    """Sum over all (row, mel) of |log-mel(frames_hat) - log-mel(frames_y)| (natural log)."""
    bf, n_fft = frames_hat.shape
    m_pad = melmat.shape[1]

    tile_m = _pick_tile_m(bf, tile_m)
    n_rt = -(-bf // tile_m)
    bf_pad = n_rt * tile_m
    if bf_pad != bf:
        # zero rows produce identical log-mels for both inputs -> contribute 0.
        zpad = ((0, bf_pad - bf), (0, 0))
        frames_hat = jnp.pad(frames_hat, zpad)
        frames_y = jnp.pad(frames_y, zpad)

    if n_ft == 1:
        # Constants fit comfortably: whole-array, single-buffered in VMEM.
        cs_spec = pl.BlockSpec(memory_space=pltpu.MemorySpace.VMEM)
        mel_spec = pl.BlockSpec(memory_space=pltpu.MemorySpace.VMEM)
    else:
        # Stream the DFT basis / mel rows by frequency tile (bounded VMEM).
        cs_spec = pl.BlockSpec((n_fft, 2 * tile_f), lambda i, j: (0, j))
        mel_spec = pl.BlockSpec((tile_f, m_pad), lambda i, j: (j, 0))

    out = pl.pallas_call(
        functools.partial(_mel_l1_kernel, eps=eps),
        out_shape=jax.ShapeDtypeStruct((n_rt, 8, m_pad), jnp.float32),
        grid_spec=pltpu.PrefetchScalarGridSpec(
            num_scalar_prefetch=0,
            grid=(n_rt, n_ft),
            in_specs=[
                pl.BlockSpec((tile_m, n_fft), lambda i, j: (i, 0)),
                pl.BlockSpec((tile_m, n_fft), lambda i, j: (i, 0)),
                cs_spec,
                mel_spec,
            ],
            out_specs=pl.BlockSpec((1, 8, m_pad), lambda i, j: (i, 0, 0)),
            scratch_shapes=[
                pltpu.VMEM((tile_m, m_pad), jnp.float32),
                pltpu.VMEM((tile_m, m_pad), jnp.float32),
            ],
        ),
        compiler_params=pltpu.CompilerParams(
            dimension_semantics=("parallel", "arbitrary"),
            vmem_limit_bytes=_vmem_budget(tile_m, n_fft, tile_f, n_ft, m_pad, vmem_cap),
        ),
    )(frames_hat, frames_y, cossin, melmat)
    return jnp.sum(out)


# ----------------------------------------------------------------------------
# Framing (torch.stft center=True, pad_mode='reflect'), gather-free when hop | fft.
# ----------------------------------------------------------------------------
def frame_signal(x, fft_size, hop_size):
    """x: (BC, T) -> frames (BC * n_frames, fft_size).  Keeps x's dtype (bf16 here)."""
    pad = fft_size // 2
    if x.shape[1] <= pad:
        raise ValueError("signal too short for center/reflect padding of this fft_size")
    xp = jnp.pad(x, ((0, 0), (pad, pad)), mode="reflect")
    t_pad = xp.shape[1]
    n_frames = 1 + (t_pad - fft_size) // hop_size
    if fft_size % hop_size == 0:
        ratio = fft_size // hop_size
        length = (n_frames - 1 + ratio) * hop_size   # == (n_frames-1)*hop + fft <= t_pad
        chunks = xp[:, :length].reshape(x.shape[0], -1, hop_size)
        frames = jnp.concatenate(
            [chunks[:, k: k + n_frames, :] for k in range(ratio)], axis=-1)
    else:
        idx = jnp.arange(n_frames)[:, None] * hop_size + jnp.arange(fft_size)[None, :]
        frames = xp[:, idx]
    return frames.reshape(-1, fft_size), n_frames


class MultiMelSpectrogramLossPallas:
    """JAX/Pallas equivalent of MultiMelSpectrogramLoss.forward."""

    def __init__(self, fs=48000,
                 fft_sizes=(256, 512, 1024, 2048, 4096),
                 hop_sizes=(64, 128, 256, 512, 1024),
                 win_lengths=(256, 512, 1024, 2048, 4096),
                 num_mels=40, fmin=0, fmax=24000,
                 eps=1e-10, log_base=10.0, tile_m=None):
        assert len(fft_sizes) == len(hop_sizes) == len(win_lengths)
        self.eps = float(eps)
        self.vmem_cap, self.base_tile_m = _detect_tpu()
        self.tile_m = tile_m    # None -> per-resolution auto (384 streamed / 256 resident / 128 v5e)
        if log_base is None:
            self.inv_ln_base = 1.0
        elif log_base == 10.0:
            self.inv_ln_base = _INV_LN10
        elif log_base == 2.0:
            self.inv_ln_base = _INV_LN2
        else:
            raise ValueError(f"log_base: {log_base} is not supported.")
        fmin = 0 if fmin is None else fmin
        fmax = fs / 2 if fmax is None else fmax
        self.num_mels = num_mels
        self.resolutions = [
            build_resolution(fs, fft, hop, win, num_mels, fmin, fmax, self.vmem_cap)
            for fft, hop, win in zip(fft_sizes, hop_sizes, win_lengths)
        ]

    def _res_tile_m(self, res):
        if self.tile_m is not None:
            return int(self.tile_m)
        return 384 if res["n_ft"] > 1 else self.base_tile_m

    def __call__(self, y_hat, y):
        # y_hat, y: (B, C, T) or (B, T)
        if y_hat.ndim == 3:
            y_hat = y_hat.reshape(-1, y_hat.shape[-1])
            y = y.reshape(-1, y.shape[-1])
        # Cast the waveform (NOT the 4x-overlapped frame slab) to bf16 before framing.
        y_hat = y_hat.astype(jnp.bfloat16)
        y = y.astype(jnp.bfloat16)
        total = jnp.float32(0.0)
        for res in self.resolutions:
            fh, _ = frame_signal(y_hat, res["fft"], res["hop"])
            fy, _ = frame_signal(y, res["fft"], res["hop"])
            n_rows = fh.shape[0]
            s = mel_l1_sum(fh, fy, res["cossin"], res["mel"], res["tile_f"], res["n_ft"],
                           self.eps, self._res_tile_m(res), self.vmem_cap)
            n_elem = n_rows * self.num_mels       # == F.l1_loss 'mean' denominator
            total = total + s * self.inv_ln_base / jnp.float32(n_elem)
        return total / jnp.float32(len(self.resolutions))

    # Pure-JAX reference (same math / same bf16 operands, no Pallas) for a sanity check.
    def reference(self, y_hat, y):
        if y_hat.ndim == 3:
            y_hat = y_hat.reshape(-1, y_hat.shape[-1])
            y = y.reshape(-1, y.shape[-1])
        y_hat = y_hat.astype(jnp.bfloat16)
        y = y.astype(jnp.bfloat16)
        total = jnp.float32(0.0)
        for res in self.resolutions:
            fh, _ = frame_signal(y_hat, res["fft"], res["hop"])
            fy, _ = frame_signal(y, res["fft"], res["hop"])

            def logmel(frames):
                re = jnp.dot(frames, res["cos_ref"], preferred_element_type=jnp.float32)
                im = jnp.dot(frames, res["sin_ref"], preferred_element_type=jnp.float32)
                amp = jnp.sqrt(jnp.maximum(re * re + im * im, self.eps))
                m = jnp.dot(amp.astype(jnp.bfloat16), res["mel"],
                            preferred_element_type=jnp.float32)
                return jnp.log(jnp.maximum(m, self.eps))

            d = jnp.abs(logmel(fh) - logmel(fy))   # padded mel columns diff == 0 exactly
            n_elem = fh.shape[0] * self.num_mels
            total = total + jnp.sum(d) * self.inv_ln_base / jnp.float32(n_elem)
        return total / jnp.float32(len(self.resolutions))


if __name__ == "__main__":
    key = jax.random.PRNGKey(0)
    k1, k2 = jax.random.split(key)
    B, C, T = 2, 1, 512
    y_hat = jax.random.normal(k1, (B, C, T), dtype=jnp.float32)
    y = jax.random.normal(k2, (B, C, T), dtype=jnp.float32)

    # Small-shape instantiation of the same module (constructor params are exposed by
    # the PyTorch module; the defaults would need T > 2048 for reflect padding).
    loss_mod = MultiMelSpectrogramLossPallas(
        fs=48000,
        fft_sizes=(128, 256, 512),
        hop_sizes=(32, 64, 128),
        win_lengths=(128, 256, 512),
        num_mels=40, fmin=0, fmax=24000, eps=1e-10, log_base=10.0,
    )

    loss = loss_mod(y_hat, y)
    jax.block_until_ready(loss)

    ref = loss_mod.reference(y_hat, y)
    jax.block_until_ready(ref)
    assert abs(float(loss) - float(ref)) <= 2e-3 * max(1.0, abs(float(ref))), (
        float(loss), float(ref))

    print("KERNEL_OK")
</pallas_src>

<mosaic_0001>
module attributes {stable_mosaic.version = 11 : i64} {
  func.func @_mel_l1_kernel(%arg0: i32, %arg1: i32, %arg2: memref<32x128xbf16, #tpu.memory_space<vmem>>, %arg3: memref<32x128xbf16, #tpu.memory_space<vmem>>, %arg4: memref<128x256xbf16, #tpu.memory_space<vmem>>, %arg5: memref<128x128xbf16, #tpu.memory_space<vmem>>, %arg6: memref<1x8x128xf32, #tpu.memory_space<vmem>>, %arg7: memref<32x128xf32, #tpu.memory_space<vmem>>, %arg8: memref<32x128xf32, #tpu.memory_space<vmem>>) attributes {dimension_semantics = [#tpu.dimension_semantics<parallel>, #tpu.dimension_semantics<arbitrary>], iteration_bounds = array<i64: 2, 1>, scalar_prefetch = 0 : i64, scratch_operands = 2 : i64, tpu.core_type = #tpu.core_type<tc>, window_params = [{transform_indices = @transform_0, window_bounds = array<i64: 32, 128>}, {transform_indices = @transform_1, window_bounds = array<i64: 32, 128>}, {pipeline_mode = #tpu.pipeline_mode<synchronous>, transform_indices = @transform_2, window_bounds = array<i64: 128, 256>}, {pipeline_mode = #tpu.pipeline_mode<synchronous>, transform_indices = @transform_3, window_bounds = array<i64: 128, 128>}, {transform_indices = @transform_4, window_bounds = array<i64: 1, 8, 128>}]} {
    %c0_i32 = arith.constant 0 : i32
    %0 = arith.cmpi eq, %arg1, %c0_i32 : i32
    %1 = arith.extui %0 : i1 to i32
    %c0_i32_0 = arith.constant 0 : i32
    %2 = arith.cmpi ne, %1, %c0_i32_0 : i32
    scf.if %2 {
      %cst_27 = arith.constant 0.000000e+00 : f32
      %40 = vector.broadcast %cst_27 : f32 to vector<32x128xf32>
      %c0_28 = arith.constant 0 : index
      %c0_29 = arith.constant 0 : index
      %41 = vector.load %arg7[%c0_28, %c0_29] : memref<32x128xf32, #tpu.memory_space<vmem>>, vector<32x128xf32>
      tpu.vector_store %arg7[%c0_28, %c0_29], %40 {strides = array<i32>} : memref<32x128xf32, #tpu.memory_space<vmem>>, vector<32x128xf32>,
      %cst_30 = arith.constant 0.000000e+00 : f32
      %42 = vector.broadcast %cst_30 : f32 to vector<32x128xf32>
      %c0_31 = arith.constant 0 : index
      %c0_32 = arith.constant 0 : index
      %43 = vector.load %arg8[%c0_31, %c0_32] : memref<32x128xf32, #tpu.memory_space<vmem>>, vector<32x128xf32>
      tpu.vector_store %arg8[%c0_31, %c0_32], %42 {strides = array<i32>} : memref<32x128xf32, #tpu.memory_space<vmem>>, vector<32x128xf32>,
    } else {
    }
    %c0 = arith.constant 0 : index
    %c0_1 = arith.constant 0 : index
    %3 = vector.load %arg2[%c0, %c0_1] : memref<32x128xbf16, #tpu.memory_space<vmem>>, vector<32x128xbf16>
    %c0_2 = arith.constant 0 : index
    %c0_3 = arith.constant 0 : index
    %4 = vector.load %arg4[%c0_2, %c0_3] : memref<128x256xbf16, #tpu.memory_space<vmem>>, vector<128x256xbf16>
    %cst = arith.constant dense<0.000000e+00> : vector<32x256xf32>
    %5 = tpu.matmul %3, %4, %cst {dimension_numbers = #tpu.dot_dimension_numbers<[1], [0], [0], [1], [0, 0, 1, 1], [], []>} : vector<32x128xbf16>, vector<128x256xbf16>, vector<32x256xf32> -> vector<32x256xf32>
    %6 = vector.extract_strided_slice %5 {offsets = [0, 0], sizes = [32, 128], strides = [1, 1]} : vector<32x256xf32> to vector<32x128xf32>
    %7 = vector.extract_strided_slice %5 {offsets = [0, 128], sizes = [32, 128], strides = [1, 1]} : vector<32x256xf32> to vector<32x128xf32>
    %8 = arith.mulf %6, %6 : vector<32x128xf32>
    %9 = arith.mulf %7, %7 : vector<32x128xf32>
    %10 = arith.addf %8, %9 : vector<32x128xf32>
    %cst_4 = arith.constant 1.000000e-10 : f32
    %11 = vector.broadcast %cst_4 : f32 to vector<32x128xf32>
    %12 = arith.maximumf %10, %11 : vector<32x128xf32>
    %13 = math.sqrt %12 : vector<32x128xf32>
    %c0_5 = arith.constant 0 : index
    %c0_6 = arith.constant 0 : index
    %14 = vector.load %arg7[%c0_5, %c0_6] : memref<32x128xf32, #tpu.memory_space<vmem>>, vector<32x128xf32>
    %15 = arith.truncf %13 : vector<32x128xf32> to vector<32x128xbf16>
    %c0_7 = arith.constant 0 : index
    %c0_8 = arith.constant 0 : index
    %16 = vector.load %arg5[%c0_7, %c0_8] : memref<128x128xbf16, #tpu.memory_space<vmem>>, vector<128x128xbf16>
    %cst_9 = arith.constant dense<0.000000e+00> : vector<32x128xf32>
    %17 = tpu.matmul %15, %16, %cst_9 {dimension_numbers = #tpu.dot_dimension_numbers<[1], [0], [0], [1], [0, 0, 1, 1], [], []>} : vector<32x128xbf16>, vector<128x128xbf16>, vector<32x128xf32> -> vector<32x128xf32>
    %18 = arith.addf %14, %17 : vector<32x128xf32>
    %c0_10 = arith.constant 0 : index
    %c0_11 = arith.constant 0 : index
    %19 = vector.load %arg7[%c0_10, %c0_11] : memref<32x128xf32, #tpu.memory_space<vmem>>, vector<32x128xf32>
    tpu.vector_store %arg7[%c0_10, %c0_11], %18 {strides = array<i32>} : memref<32x128xf32, #tpu.memory_space<vmem>>, vector<32x128xf32>,
    %c0_12 = arith.constant 0 : index
    %c0_13 = arith.constant 0 : index
    %20 = vector.load %arg3[%c0_12, %c0_13] : memref<32x128xbf16, #tpu.memory_space<vmem>>, vector<32x128xbf16>
    %c0_14 = arith.constant 0 : index
    %c0_15 = arith.constant 0 : index
    %21 = vector.load %arg4[%c0_14, %c0_15] : memref<128x256xbf16, #tpu.memory_space<vmem>>, vector<128x256xbf16>
    %cst_16 = arith.constant dense<0.000000e+00> : vector<32x256xf32>
    %22 = tpu.matmul %20, %21, %cst_16 {dimension_numbers = #tpu.dot_dimension_numbers<[1], [0], [0], [1], [0, 0, 1, 1], [], []>} : vector<32x128xbf16>, vector<128x256xbf16>, vector<32x256xf32> -> vector<32x256xf32>
    %23 = vector.extract_strided_slice %22 {offsets = [0, 0], sizes = [32, 128], strides = [1, 1]} : vector<32x256xf32> to vector<32x128xf32>
    %24 = vector.extract_strided_slice %22 {offsets = [0, 128], sizes = [32, 128], strides = [1, 1]} : vector<32x256xf32> to vector<32x128xf32>
    %25 = arith.mulf %23, %23 : vector<32x128xf32>
    %26 = arith.mulf %24, %24 : vector<32x128xf32>
    %27 = arith.addf %25, %26 : vector<32x128xf32>
    %cst_17 = arith.constant 1.000000e-10 : f32
    %28 = vector.broadcast %cst_17 : f32 to vector<32x128xf32>
    %29 = arith.maximumf %27, %28 : vector<32x128xf32>
    %30 = math.sqrt %29 : vector<32x128xf32>
    %c0_18 = arith.constant 0 : index
    %c0_19 = arith.constant 0 : index
    %31 = vector.load %arg8[%c0_18, %c0_19] : memref<32x128xf32, #tpu.memory_space<vmem>>, vector<32x128xf32>
    %32 = arith.truncf %30 : vector<32x128xf32> to vector<32x128xbf16>
    %c0_20 = arith.constant 0 : index
    %c0_21 = arith.constant 0 : index
    %33 = vector.load %arg5[%c0_20, %c0_21] : memref<128x128xbf16, #tpu.memory_space<vmem>>, vector<128x128xbf16>
    %cst_22 = arith.constant dense<0.000000e+00> : vector<32x128xf32>
    %34 = tpu.matmul %32, %33, %cst_22 {dimension_numbers = #tpu.dot_dimension_numbers<[1], [0], [0], [1], [0, 0, 1, 1], [], []>} : vector<32x128xbf16>, vector<128x128xbf16>, vector<32x128xf32> -> vector<32x128xf32>
    %35 = arith.addf %31, %34 : vector<32x128xf32>
    %c0_23 = arith.constant 0 : index
    %c0_24 = arith.constant 0 : index
    %36 = vector.load %arg8[%c0_23, %c0_24] : memref<32x128xf32, #tpu.memory_space<vmem>>, vector<32x128xf32>
    tpu.vector_store %arg8[%c0_23, %c0_24], %35 {strides = array<i32>} : memref<32x128xf32, #tpu.memory_space<vmem>>, vector<32x128xf32>,
    %c0_i32_25 = arith.constant 0 : i32
    %37 = arith.cmpi eq, %arg1, %c0_i32_25 : i32
    %38 = arith.extui %37 : i1 to i32
    %c0_i32_26 = arith.constant 0 : i32
    %39 = arith.cmpi ne, %38, %c0_i32_26 : i32
    scf.if %39 {
      %c0_27 = arith.constant 0 : index
      %c0_28 = arith.constant 0 : index
      %40 = vector.load %arg7[%c0_27, %c0_28] : memref<32x128xf32, #tpu.memory_space<vmem>>, vector<32x128xf32>
      %cst_29 = arith.constant 1.000000e-10 : f32
      %41 = vector.broadcast %cst_29 : f32 to vector<32x128xf32>
      %42 = arith.maximumf %40, %41 : vector<32x128xf32>
      %43 = math.log %42 : vector<32x128xf32>
      %c0_30 = arith.constant 0 : index
      %c0_31 = arith.constant 0 : index
      %44 = vector.load %arg8[%c0_30, %c0_31] : memref<32x128xf32, #tpu.memory_space<vmem>>, vector<32x128xf32>
      %cst_32 = arith.constant 1.000000e-10 : f32
      %45 = vector.broadcast %cst_32 : f32 to vector<32x128xf32>
      %46 = arith.maximumf %44, %45 : vector<32x128xf32>
      %47 = math.log %46 : vector<32x128xf32>
      %48 = arith.subf %43, %47 : vector<32x128xf32>
      %49 = math.absf %48 : vector<32x128xf32>
      %50 = vector.shape_cast %49 : vector<32x128xf32> to vector<4x8x128xf32>
      %cst_33 = arith.constant dense<0.000000e+00> : vector<8x128xf32>
      %51 = vector.multi_reduction <add>, %50, %cst_33 [0] : vector<4x8x128xf32> to vector<8x128xf32>
      %52 = vector.shape_cast %51 : vector<8x128xf32> to vector<1x8x128xf32>
      %c0_34 = arith.constant 0 : index
      %c0_35 = arith.constant 0 : index
      %c0_36 = arith.constant 0 : index
      %53 = vector.load %arg6[%c0_34, %c0_35, %c0_36] : memref<1x8x128xf32, #tpu.memory_space<vmem>>, vector<1x8x128xf32>
      tpu.vector_store %arg6[%c0_34, %c0_35, %c0_36], %52 {strides = array<i32>} : memref<1x8x128xf32, #tpu.memory_space<vmem>>, vector<1x8x128xf32>,
    } else {
    }
    return
  }
  func.func @transform_0(%arg0: i32, %arg1: i32) -> (i32, i32) {
    %c0_i32 = arith.constant 0 : i32
    %c0_i32_0 = arith.constant 0 : i32
    return %arg0, %c0_i32 : i32, i32
  }
  func.func @transform_1(%arg0: i32, %arg1: i32) -> (i32, i32) {
    %c0_i32 = arith.constant 0 : i32
    %c0_i32_0 = arith.constant 0 : i32
    return %arg0, %c0_i32 : i32, i32
  }
  func.func @transform_2(%arg0: i32, %arg1: i32) -> (i32, i32) {
    %c0_i32 = arith.constant 0 : i32
    %c0_i32_0 = arith.constant 0 : i32
    %c0_i32_1 = arith.constant 0 : i32
    return %c0_i32, %c0_i32_0 : i32, i32
  }
  func.func @transform_3(%arg0: i32, %arg1: i32) -> (i32, i32) {
    %c0_i32 = arith.constant 0 : i32
    %c0_i32_0 = arith.constant 0 : i32
    %c0_i32_1 = arith.constant 0 : i32
    return %c0_i32, %c0_i32_0 : i32, i32
  }
  func.func @transform_4(%arg0: i32, %arg1: i32) -> (i32, i32, i32) {
    %c0_i32 = arith.constant 0 : i32
    %c0_i32_0 = arith.constant 0 : i32
    %c0_i32_1 = arith.constant 0 : i32
    return %arg0, %c0_i32, %c0_i32_0 : i32, i32, i32
  }
}

</mosaic_0001>

<bundles_post_ra>
// kernel: tpu_custom_call.1
= control target key start
LH: loop header
LB: loop body
LE: loop exit
PB: predicated region body
PF: predicated region fallthrough
CT: control target
= control target key end

     0   :  { %s2054_s0 = inlined_call_operand.hbm [shape: bf16[64,128], index: 0, kind: input, shape index: {}]   ;;  %s2055_s1 = inlined_call_operand.hbm [shape: bf16[64,128], index: 1, kind: input, shape index: {}]   ;;  %s2056_s2 = inlined_call_operand.hbm [shape: bf16[128,256], index: 2, kind: input, shape index: {}]   ;;  %s2057_s3 = inlined_call_operand.hbm [shape: bf16[128,128], index: 3, kind: input, shape index: {}]   ;;  %s2058_s4 = inlined_call_operand.hbm [shape: f32[2,8,128], index: 4, kind: output, shape index: {}]  }
   0x1   :  { %2065 = sst [smem:[#allocation21_spill]] %s2056_s2 }
   0x2   :  { %2066 = sst [smem:[#allocation22_spill]] %s2057_s3 }
   0x3   :  { %9 = vsyncpa [#allocation5], 0 }
   0x4   :  { %11 = vsyncpa [#allocation5 + $0x1], 0 }
   0x5   :  { %12 = vsyncpa [#allocation8], 0 }
   0x6   :  { %14 = vsyncpa [#allocation8 + $0x1], 0 }
   0x7   :  { %15 = vsyncpa [#allocation11], 0 }
   0x8   :  { %16 = vsyncpa [#allocation6], 0 }
   0x9   :  { %18 = vsyncpa [#allocation6 + $0x1], 0  ;;  %s1795_s15 = smov 0   ;;  %s1797_s16 = smov 0  }
   0xa   :  { %s1799_s17 = smov 0   ;;  %s1801_s18 = smov 0  }
   0xb   :  { %s1803_s19 = smov 0   ;;  %s1805_s20 = smov 0  }
   0xc LB: > { %2067 = sst [smem:[#allocation18_spill]] %s1758_s19  ;;  %s1826_s21 = sadd.s32 4294967295, %s1762_s20   ;;  %s1762_s20 = sphi %s1805_s20, %s24_s20   ;;  %s1758_s19 = sphi %s1803_s19, %s2085_s19   ;;  %s1754_s18 = sphi %s1801_s18, %s2080_s18   ;;  %s1750_s17 = sphi %s1799_s17, %s2084_s17   ;;  %s1746_s16 = sphi %s1797_s16, %s2083_s16   ;;  %s1742_s15 = sphi %s1795_s15, %s2082_s15  }
   0xd   : > { %s1125_s22 = sadd.s32 4294967294, %s1762_s20   ;;  %p56_p0 = scmp.ne.s32.totalorder %s1746_s16, %s1742_s15 }
   0xe   : > { %p57_p1 = scmp.eq.s32.totalorder %s1826_s21, 0  ;;  %p148_p2 = scmp.eq.s32.totalorder %s1826_s21, 1 }
   0xf   : > { %p154_p3 = scmp.eq.s32.totalorder %s1125_s22, 1  ;;  %p1126_p5 = scmp.ge.s32.totalorder %s1762_s20, 1 }
  0x10   : > { %p1835_p4 = por %p57_p1, %p56_p0  ;;  %p161_p7 = scmp.lt.s32.totalorder %s1762_s20, 3 }
  0x11   : > { %p1840_p6 = por %p154_p3, %p56_p0  ;;  %s2070_s2 = sld [smem:[#allocation21_spill]] }
  0x12   : > { %p1848_p8 = pnand %p1126_p5, %p161_p7  ;;  %s1764_s29 = smov [#allocation9]  }
  0x13   : > { %s174_s30 = sshll.u32 %s1764_s29, 4  ;;  %p1129_p11 = scmp.ge.s32.totalorder %s1762_s20, 2  ;;  %s175_s30 = int_to_ptr.vmem [resolvable:$true] %s174_s30 }
  0x14   : > { %p1438_p9 = pneg %p1848_p8  ;;  %s2072_s3 = sld [smem:[#allocation22_spill]] }
  0x15   : > { %s1765_s8 = smov 128   ;;  %s1766_s9 = smov 8  }
  0x16   : > { %p1439_p10 = pnand %p1438_p9, %p57_p1  ;;  %s1767_s10 = smov [#allocation10]  }
  0x17   : > { %s172_s27 = sshll.u32 %s2070_s2, 4  ;;  %s188_s11 = sshll.u32 %s1767_s10, 4  ;;  %s173_s27 = int_to_ptr.hbm [resolvable:$true] %s172_s27  ;;  %s189_s11 = int_to_ptr.vmem [resolvable:$true] %s188_s11 }
  0x18   : > { %1441 = dma.hbm_to_vmem [thread:$0]  (!%p1439_p10), %s173_s27, 2048, %s175_s30, [#allocation8], %s1765_s8, %s1765_s8, %s1766_s9  }
  0x19   : > { %s2059_s12 = smov 64   ;;  %s2061_s13 = smov 4  }
  0x1a   : > { %s186_s7 = sshll.u32 %s2072_s3, 4  ;;  %s36_s14 = sadd.s32 1, %s1758_s19  ;;  %s187_s7 = int_to_ptr.hbm [resolvable:$true] %s186_s7 }
  0x1b   : > { %1444 = dma.hbm_to_vmem [thread:$0]  (!%p1439_p10), %s187_s7, 1024, %s189_s11, [#allocation11], %s2059_s12, %s2059_s12, %s2061_s13  }
  0x1c   : > { %s43_s22 = sadd.s32 1, %s1750_s17  ;;  %p38_p12 = scmp.ge.s32.totalorder %s36_s14, 2 }
  0x1d   : > { %p50_p13 = scmp.ne.s32.totalorder %s1750_s17, %s1746_s16  ;;  %p51_p0 = scmp.eq.s32.totalorder %s1762_s20, 0 }
  0x1e   : > { %p1458_p3 = scmp.lt.s32.totalorder %s1762_s20, 2  ;;  %s2087_s14 = smov (%p38_p12, %s36_s14), 0 }
  0x1f   : > { %2073 = sst [smem:[#allocation19_spill]] %s2087_s14  ;;  %p1871_p5 = por %p51_p0, %p50_p13 }
  0x20   : > { %p1877_p7 = por %p148_p2, %p50_p13  ;;  %s40_s27 = ssub.s32 %s1758_s19, %s2087_s14 }
  0x21   : > { %s202_s29 = sand.u32 1, %s1750_s17   ;;  %p41_p9 = scmp.eq.s32.totalorder %s40_s27, 0 }
  0x22   : > { %s1130_s30 = sshll.u32 %s202_s29, 4  ;;  %s1354_s5 = sshll.u32 %s1758_s19, 4 }
  0x23   : > { %s1886_s6 = scalar_select %p41_p9, %s1750_s17, %s43_s22  }
  0x24   : > { %s211_s9 = scalar_lea.hbm %s2054_s0, %s1354_s5  ;;  %s206_s11 = scalar_lea.vmem [#allocation4], %s1130_s30 }
  0x25   : > { %2076 = sst [smem:[#allocation20_spill]] %s1886_s6  ;;  %s212_s10 = sshll.u32 %s211_s9, 4  ;;  %s213_s10 = int_to_ptr.hbm [resolvable:$true] %s212_s10 }
  0x26   : > { %s214_s12 = sshll.u32 %s206_s11, 4  ;;  %p1446_p2 = pnand %p1458_p3, %p1871_p5  ;;  %s215_s12 = int_to_ptr.vmem [resolvable:$true] %s214_s12 }
  0x27   : > { %s233_s27 = scalar_lea.hbm %s2055_s1, %s1354_s5  ;;  %s228_s3 = scalar_lea.vmem [#allocation7], %s1130_s30 }
  0x28   : > { %s236_s22 = sshll.u32 %s228_s3, 4  ;;  %s234_s14 = sshll.u32 %s233_s27, 4  ;;  %s235_s14 = int_to_ptr.hbm [resolvable:$true] %s234_s14  ;;  %s237_s22 = int_to_ptr.vmem [resolvable:$true] %s236_s22 }
  0x29   : > { %s203_s19 = scalar_lea.sflag [#allocation5], %s202_s29  ;;  %s2077_s6 = smov 4  }
  0x2a   : > { %s2078_s7 = smov 64   ;;  %s224_s8 = sand.u32 1, %s1762_s20  }
  0x2b   : > { %1448 = dma.hbm_to_vmem [thread:$0]  (!%p1446_p2), %s213_s10, 256, %s215_s12, %s203_s19, %s2078_s7, %s2078_s7, %s2077_s6  }
  0x2c   : > { %s225_s9 = scalar_lea.sflag [#allocation8], %s224_s8  ;;  %248 = sbr.rel (%p1848_p8) target bundleno = 616 (0x268), region = 36 }
  0x2d   : > { %1451 = dma.hbm_to_vmem [thread:$0]  (!%p1446_p2), %s235_s14, 256, %s237_s22, %s225_s9, %s2078_s7, %s2078_s7, %s2077_s6  }
  0x2e   : > { %s1908_s2 = sand.u32 (!%p1848_p8), 1, %s1746_s16  }
  0x2f   : > { %s1137_s3 = sshll.u32 (!%p1848_p8), %s1908_s2, 4  ;;  %s251_s13 = scalar_lea.sflag (!%p1848_p8), [#allocation5], %s1908_s2 }
  0x30   : > { %s1912_s19 = scalar_lea.vmem (!%p1848_p8), [#allocation4], %s1137_s3 }
  0x31   : > { %1721 = dma.done.wait (%p1835_p4), %s251_s13, 256  }
  0x32   : > { %1723 = vsyncadd (%p1835_p4), %s251_s13, 4294967040  ;;  %s260_s12 = sand.u32 1, %s1826_s21   ;;  %s1919_s14 = scalar_lea.vmem [#allocation7], %s1137_s3 }
  0x33   : > { %s261_s28 = scalar_lea.sflag [#allocation8], %s260_s12 }
  0x34   : > { %1725 = dma.done.wait (%p1835_p4), %s261_s28, 256  }
  0x35   : > { %1727 = vsyncadd (%p1835_p4), %s261_s28, 4294967040 }
  0x36   : > { %1729 = dma.done.wait (%p57_p1), [#allocation8], 2048  }
  0x37   : > { %1731 = vsyncadd (%p57_p1), [#allocation8], 4294965248 }
  0x38   : > { %1733 = dma.done.wait (%p57_p1), [#allocation11], 1024  }
  0x39   : > { %1735 = vsyncadd (%p57_p1), [#allocation11], 4294966272  ;;  %v1208_v0 = vld [vmem:[#allocation9 + $0x70] sm:$0xf]  ;;  %v1373_v1 = vld [vmem:[#allocation9 + $0x74] sm:$0xf0] }
  0x3a   : > { %v1372_v2 = vld [vmem:[#allocation9 + $0x74] sm:$0xf]  ;;  %v1209_v3 = vor.u32 %v1373_v1, %v1208_v0  ;;  %v1210_v4 = vld [vmem:[#allocation9 + $0x78] sm:$0xf0]  ;;  %v1200_v5 = vld [vmem:[#allocation9 + $0x60] sm:$0xf] }
  0x3b   : > { %v1371_v6 = vld [vmem:[#allocation9 + $0x64] sm:$0xf0]  ;;  %v1213_v7 = vor.u32 %v1372_v2, %v1210_v4  ;;  %v1370_v8 = vld [vmem:[#allocation9 + $0x64] sm:$0xf]  ;;  %v1202_v9 = vld [vmem:[#allocation9 + $0x68] sm:$0xf0] }
  0x3c   : > { %431 = vmatpush.bf16.msra.mxu0 %v1209_v3  ;;  %v1201_v10 = vor.u32 %v1371_v6, %v1200_v5  ;;  %v1205_v11 = vor.u32 %v1370_v8, %v1202_v9  ;;  %v1192_v12 = vld [vmem:[#allocation9 + $0x50] sm:$0xf]  ;;  %v1369_v13 = vld [vmem:[#allocation9 + $0x54] sm:$0xf0]  ;;  %v1368_v14 = vld [vmem:[#allocation9 + $0x54] sm:$0xf] }
  0x3d   : > { %450 = vmatpush.bf16.msra.mxu1 %v1213_v7  ;;  %v1194_v15 = vld [vmem:[#allocation9 + $0x58] sm:$0xf0]  ;;  %v1193_v16 = vor.u32 %v1369_v13, %v1192_v12  ;;  %v1184_v18 = vld [vmem:[#allocation9 + $0x40] sm:$0xf]  ;;  %v1367_v19 = vld [vmem:[#allocation9 + $0x44] sm:$0xf0] }
  0x3e   : > { %v1197_v17 = vor.u32 %v1368_v14, %v1194_v15  ;;  %v1366_v20 = vld [vmem:[#allocation9 + $0x44] sm:$0xf]  ;;  %v1186_v21 = vld [vmem:[#allocation9 + $0x48] sm:$0xf0]  ;;  %v1312_v22 = vld [vmem:[#allocation9 + $0x70] sm:$0xf]  ;;  %v1185_v25 = vor.u32 %v1367_v19, %v1184_v18 }
  0x3f   : > { %v1399_v23 = vld [vmem:[#allocation9 + $0x74] sm:$0xf0]  ;;  %v1304_v26 = vld [vmem:[#allocation9 + $0x60] sm:$0xf]  ;;  %v1397_v27 = vld [vmem:[#allocation9 + $0x64] sm:$0xf0]  ;;  %v1189_v28 = vor.u32 %v1366_v20, %v1186_v21 }
  0x40   : > { %432 = vmatpush.bf16.msra.mxu0 %v1201_v10  ;;  %v1313_v24 = vor.u32 %v1399_v23, %v1312_v22  ;;  %v1176_v29 = vld [vmem:[#allocation9 + $0x30] sm:$0xf]  ;;  %v1365_v30 = vld [vmem:[#allocation9 + $0x34] sm:$0xf0]  ;;  %v1364_v31 = vld [vmem:[#allocation9 + $0x34] sm:$0xf]  ;;  %v1305_v32 = vor.u32 %v1397_v27, %v1304_v26 }
  0x41   : > { %451 = vmatpush.bf16.msra.mxu1 %v1205_v11  ;;  %v1178_v33 = vld [vmem:[#allocation9 + $0x38] sm:$0xf0]  ;;  %v1296_v34 = vld [vmem:[#allocation9 + $0x50] sm:$0xf]  ;;  %v1395_v35 = vld [vmem:[#allocation9 + $0x54] sm:$0xf0]  ;;  %v1177_v36 = vor.u32 %v1365_v30, %v1176_v29 }
  0x42   : > { %742 = vmatpush.bf16.msra.mxu3 %v1313_v24  ;;  %v1181_v37 = vor.u32 %v1364_v31, %v1178_v33  ;;  %v1168_v38 = vld [vmem:[#allocation9 + $0x20] sm:$0xf]  ;;  %v1363_v39 = vld [vmem:[#allocation9 + $0x24] sm:$0xf0]  ;;  %v1362_v40 = vld [vmem:[#allocation9 + $0x24] sm:$0xf]  ;;  %v1297_v41 = vor.u32 %v1395_v35, %v1296_v34 }
  0x43   : > { %v1170_v42 = vld [vmem:[#allocation9 + $0x28] sm:$0xf0]  ;;  %v1288_v43 = vld [vmem:[#allocation9 + $0x40] sm:$0xf]  ;;  %v1393_v44 = vld [vmem:[#allocation9 + $0x44] sm:$0xf0]  ;;  %v1169_v45 = vor.u32 %v1363_v39, %v1168_v38 }
  0x44   : > { %433 = vmatpush.bf16.msra.mxu0 %v1193_v16  ;;  %v1173_v46 = vor.u32 %v1362_v40, %v1170_v42  ;;  %v1160_v47 = vld [vmem:[#allocation9 + $0x10] sm:$0xf]  ;;  %v1361_v48 = vld [vmem:[#allocation9 + $0x14] sm:$0xf0]  ;;  %v1360_v49 = vld [vmem:[#allocation9 + $0x14] sm:$0xf]  ;;  %v1289_v50 = vor.u32 %v1393_v44, %v1288_v43 }
  0x45   : > { %452 = vmatpush.bf16.msra.mxu1 %v1197_v17  ;;  %v1162_v51 = vld [vmem:[#allocation9 + $0x18] sm:$0xf0]  ;;  %v1280_v52 = vld [vmem:[#allocation9 + $0x30] sm:$0xf]  ;;  %v1391_v53 = vld [vmem:[#allocation9 + $0x34] sm:$0xf0]  ;;  %v1161_v54 = vor.u32 %v1361_v48, %v1160_v47 }
  0x46   : > { %743 = vmatpush.bf16.msra.mxu3 %v1305_v32  ;;  %v1165_v55 = vor.u32 %v1360_v49, %v1162_v51  ;;  %v1152_v56 = vld [vmem:[#allocation9] sm:$0xf]  ;;  %v1359_v57 = vld [vmem:[#allocation9 + $0x4] sm:$0xf0]  ;;  %v1358_v58 = vld [vmem:[#allocation9 + $0x4] sm:$0xf]  ;;  %v1281_v59 = vor.u32 %v1391_v53, %v1280_v52 }
  0x47   : > { %v1154_v60 = vld [vmem:[#allocation9 + $0x8] sm:$0xf0]  ;;  %v1398_v61 = vld [vmem:[#allocation9 + $0x74] sm:$0xf]  ;;  %v1314_v62 = vld [vmem:[#allocation9 + $0x78] sm:$0xf0]  ;;  %v1153_v1 = vor.u32 %v1359_v57, %v1152_v56 }
  0x48   : > { %434 = vmatpush.bf16.msra.mxu0 %v1185_v25  ;;  %v1272_v63 = vld [vmem:[#allocation9 + $0x20] sm:$0xf]  ;;  %v1389_v0 = vld [vmem:[#allocation9 + $0x24] sm:$0xf0]  ;;  %v1157_v2 = vor.u32 %v1358_v58, %v1154_v60  ;;  %v1933_v3 = vor.u32 %v1398_v61, %v1314_v62  ;;  %v1396_v4 = vld [vmem:[#allocation9 + $0x64] sm:$0xf] }
  0x49   : > { %453 = vmatpush.bf16.msra.mxu1 %v1189_v28  ;;  %v1306_v5 = vld [vmem:[#allocation9 + $0x68] sm:$0xf0]  ;;  %v1273_v6 = vor.u32 %v1389_v0, %v1272_v63  ;;  %v1356_v7 = vld [vmem:[%s1912_s19] sm:$0xff]  ;;  %v1387_v9 = vld [vmem:[#allocation9 + $0x14] sm:$0xf0]  ;;  %s1141_s21 = sshll.u32 %s1908_s2, 3 }
  0x4a   : > { %744 = vmatpush.bf16.msra.mxu3 %v1297_v41  ;;  %v1264_v8 = vld [vmem:[#allocation9 + $0x10] sm:$0xf]  ;;  %v1937_v10 = vor.u32 %v1396_v4, %v1306_v5  ;;  %v1394_v11 = vld [vmem:[#allocation9 + $0x54] sm:$0xf]  ;;  %v1298_v12 = vld [vmem:[#allocation9 + $0x58] sm:$0xf0] }
  0x4b   : > { %v1265_v13 = vor.u32 %v1387_v9, %v1264_v8  ;;  %v1256_v14 = vld [vmem:[#allocation9] sm:$0xf]  ;;  %v1385_v15 = vld [vmem:[#allocation9 + $0x4] sm:$0xf0]  ;;  %v1940_v16 = vor.u32 %v1394_v11, %v1298_v12  ;;  %v1392_v17 = vld [vmem:[#allocation9 + $0x44] sm:$0xf] }
  0x4c   : > { %435 = vmatpush.bf16.msra.mxu0 %v1177_v36  ;;  %v1290_v18 = vld [vmem:[#allocation9 + $0x48] sm:$0xf0]  ;;  %v1257_v19 = vor.u32 %v1385_v15, %v1256_v14  ;;  %v1382_v21 = vld [vmem:[%s1919_s14] sm:$0xff]  ;;  %v1282_v23 = vld [vmem:[#allocation9 + $0x38] sm:$0xf0]  ;;  %s1351_s23 = sshll.u32 %s1754_s18, 3 }
  0x4d   : > { %454 = vmatpush.bf16.msra.mxu1 %v1181_v37  ;;  %v1943_v20 = vor.u32 %v1392_v17, %v1290_v18  ;;  %v1390_v22 = vld [vmem:[#allocation9 + $0x34] sm:$0xf]  ;;  %v1388_v25 = vld [vmem:[#allocation9 + $0x24] sm:$0xf]  ;;  %v1274_v26 = vld [vmem:[#allocation9 + $0x28] sm:$0xf0]  ;;  %s999_s30 = scalar_lea.hbm %s2058_s4, %s1351_s23 }
  0x4e   : > { %745 = vmatpush.bf16.msra.mxu3 %v1289_v50  ;;  %v1947_v24 = vor.u32 %v1390_v22, %v1282_v23  ;;  %v1357_v27 = vld [vmem:[%s1912_s19 + $0x8] sm:$0xff]  ;;  %v1951_v28 = vor.u32 %v1388_v25, %v1274_v26  ;;  %v1386_v29 = vld [vmem:[#allocation9 + $0x14] sm:$0xf]  ;;  %v1384_v32 = vld [vmem:[#allocation9 + $0x4] sm:$0xf]  ;;  %s304_s5 = scalar_lea.vmem [#allocation12], %s1141_s21 }
  0x4f   : > { %v1266_v30 = vld [vmem:[#allocation9 + $0x18] sm:$0xf0]  ;;  %v1258_v33 = vld [vmem:[#allocation9 + $0x8] sm:$0xf0]  ;;  %v1380_v36 = vld [vmem:[#allocation10 + $0x30] sm:$0xff]  ;;  %s1001_s6 = sshll.u32 %s304_s5, 4  ;;  %s1002_s6 = int_to_ptr.vmem [resolvable:$true] %s1001_s6 }
  0x50   : > { %436 = vmatpush.bf16.msra.mxu0 %v1169_v45  ;;  %v1954_v31 = vor.u32 %v1386_v29, %v1266_v30  ;;  %v1957_v34 = vor.u32 %v1384_v32, %v1258_v33  ;;  %v1381_v35 = vld [vmem:[#allocation10 + $0x38] sm:$0xff]  ;;  %v1379_v37 = vld [vmem:[#allocation10 + $0x28] sm:$0xff]  ;;  %v1378_v38 = vld [vmem:[#allocation10 + $0x20] sm:$0xff]  ;;  %s1003_s10 = sshll.u32 %s999_s30, 4  ;;  %s989_s11 = scalar_lea.sflag [#allocation6], %s1908_s2  ;;  %s1004_s10 = int_to_ptr.hbm [resolvable:$true] %s1003_s10 }
  0x51   : > { %455 = vmatpush.bf16.msra.mxu1 %v1173_v46  ;;  %603 = vmatpush.bf16.msra.mxu2 %v1381_v35  ;;  %v1377_v39 = vld [vmem:[#allocation10 + $0x18] sm:$0xff]  ;;  %v1376_v40 = vld [vmem:[#allocation10 + $0x10] sm:$0xff]  ;;  %v1375_v41 = vld [vmem:[#allocation10 + $0x8] sm:$0xff]  ;;  %s1682_s18 = sshra.s32 %s1004_s10, 4  ;;  %s1688_s8 = scalar_lea.hbm %s2058_s4, 16  ;;  %s1683_s18 = int_to_ptr.hbm [resolvable:$true] %s1682_s18 }
  0x52   : > { %746 = vmatpush.bf16.msra.mxu3 %v1281_v59  ;;  %v1374_v46 = vld [vmem:[#allocation10] sm:$0xff]  ;;  %v1407_v49 = vld [vmem:[#allocation10 + $0x38] sm:$0xff]  ;;  %v1405_v58 = vld [vmem:[#allocation10 + $0x28] sm:$0xff]  ;;  %s1684_s27 = scalar_lea.hbm %s1683_s18, 8  ;;  %p1689_p10 = scmp.lt.s32.totalorder %s1683_s18, %s2058_s4 }
  0x53   : > { %v1404_v61 = vld [vmem:[#allocation10 + $0x20] sm:$0xff]  ;;  %v1976_v9 = vld [vmem:[%s1919_s14 + $0x8] sm:$0xff]  ;;  %v1402_v11 = vld [vmem:[#allocation10 + $0x10] sm:$0xff]  ;;  %p1685_p1 = scmp.ne.s32.totalorder %s1683_s18, %s1684_s27  ;;  %p1690_p12 = scmp.lt.s32.totalorder %s1688_s8, %s1684_s27 }
  0x54   : > { %437 = vmatpush.bf16.msra.mxu0 %v1161_v54  ;;  %v1406_v54 = vld [vmem:[#allocation10 + $0x30] sm:$0xff]  ;;  %v1400_v29 = vld [vmem:[#allocation10] sm:$0xff] }
  0x55   : > { %456 = vmatpush.bf16.msra.mxu1 %v1165_v55  ;;  %604 = vmatpush.bf16.msra.mxu2 %v1380_v36  ;;  %p1686_p4 = pnand %p1685_p1, %p1877_p7  ;;  %p1691_p13 = por %p1690_p12, %p1689_p10 }
  0x56   : > { %747 = vmatpush.bf16.msra.mxu3 %v1273_v6 }
  0x57   : > { %p1687_p8 = pneg %p1686_p4 }
  0x58   : > { %438 = vmatpush.bf16.msra.mxu0 %v1153_v1 }
  0x59   : > { %457 = vmatpush.bf16.msra.mxu1 %v1157_v2  ;;  %605 = vmatpush.bf16.msra.mxu2 %v1379_v37  ;;  %p1692_p0 = pnand %p1691_p13, %p1687_p8 }
  0x5a   : > { %748 = vmatpush.bf16.msra.mxu3 %v1265_v13 }
  0x5b   : > { %439 = vmatmul.bf16.vlgmr.msra.gmra.mxu0 %v1356_v7 }
  0x5c   : > { %761 = vmatpush.bf16.msrb.mxu0 %v1933_v3  ;;  %458 = vmatmul.bf16.vlgmr.msra.gmra.mxu1 %v1356_v7  ;;  %v1403_v7 = vld [vmem:[#allocation10 + $0x18] sm:$0xff] }
  0x5d   : > { %606 = vmatpush.bf16.msra.mxu2 %v1378_v38  ;;  %914 = vmatpush.bf16.msrb.mxu1 %v1407_v49 }
  0x5e   : > { %749 = vmatpush.bf16.msra.mxu3 %v1257_v19 }
  0x60   : > { %762 = vmatpush.bf16.msrb.mxu0 %v1937_v10 }
  0x61   : > { %750 = vmatmul.bf16.vlgmr.msra.gmra.mxu3 %v1382_v21  ;;  %607 = vmatpush.bf16.msra.mxu2 %v1377_v39 }
  0x62   : > { %1416 = vmatpush.bf16.msrb.mxu3 %v1407_v49  ;;  %915 = vmatpush.bf16.msrb.mxu1 %v1406_v54 }
  0x64   : > { %763 = vmatpush.bf16.msrb.mxu0 %v1940_v16 }
  0x65   : > { %608 = vmatpush.bf16.msra.mxu2 %v1376_v40 }
  0x66   : > { %1417 = vmatpush.bf16.msrb.mxu3 %v1406_v54  ;;  %916 = vmatpush.bf16.msrb.mxu1 %v1405_v58 }
  0x68   : > { %764 = vmatpush.bf16.msrb.mxu0 %v1943_v20 }
  0x69   : > { %609 = vmatpush.bf16.msra.mxu2 %v1375_v41 }
  0x6a   : > { %1418 = vmatpush.bf16.msrb.mxu3 %v1405_v58  ;;  %917 = vmatpush.bf16.msrb.mxu1 %v1404_v61 }
  0x6b   : > { %444 = vmatmul.bf16.gmra.mxu0 %v1357_v27 }
  0x6c   : > { %765 = vmatpush.bf16.msrb.mxu0 %v1947_v24  ;;  %463 = vmatmul.bf16.gmra.mxu1 %v1357_v27 }
  0x6d   : > { %610 = vmatpush.bf16.msra.mxu2 %v1374_v46 }
  0x6e   : > { %1419 = vmatpush.bf16.msrb.mxu3 %v1404_v61  ;;  %918 = vmatpush.bf16.msrb.mxu1 %v1403_v7 }
  0x70   : > { %766 = vmatpush.bf16.msrb.mxu0 %v1951_v28 }
  0x71   : > { %1408 = vmatpush.bf16.msrb.mxu2 %v1933_v3  ;;  %755 = vmatmul.bf16.gmra.mxu3 %v1976_v9 }
  0x72   : > { %1420 = vmatpush.bf16.msrb.mxu3 %v1403_v7  ;;  %919 = vmatpush.bf16.msrb.mxu1 %v1402_v11 }
  0x74   : > { %767 = vmatpush.bf16.msrb.mxu0 %v1954_v31 }
  0x75   : > { %1409 = vmatpush.bf16.msrb.mxu2 %v1937_v10 }
  0x76   : > { %1421 = vmatpush.bf16.msrb.mxu3 %v1402_v11 }
  0x78   : > { %768 = vmatpush.bf16.msrb.mxu0 %v1957_v34 }
  0x79   : > { %1410 = vmatpush.bf16.msrb.mxu2 %v1940_v16 }
  0x7b   : > { %769 = vmatmul.bf16.vlgmr.msrb.gmra.mxu0 %v1382_v21 }
  0x7d   : > { %1411 = vmatpush.bf16.msrb.mxu2 %v1943_v20  ;;  %v1401_v20 = vld [vmem:[#allocation10 + $0x8] sm:$0xff] }
  0x7e   : > { %920 = vmatpush.bf16.msrb.mxu1 %v1401_v20  ;;  %1422 = vmatpush.bf16.msrb.mxu3 %v1401_v20 }
  0x81   : > { %1412 = vmatpush.bf16.msrb.mxu2 %v1947_v24 }
  0x82   : > { %921 = vmatpush.bf16.msrb.mxu1 %v1400_v29  ;;  %1423 = vmatpush.bf16.msrb.mxu3 %v1400_v29 }
  0x85   : > { %1413 = vmatpush.bf16.msrb.mxu2 %v1951_v28 }
  0x89   : > { %1414 = vmatpush.bf16.msrb.mxu2 %v1954_v31 }
  0x8d   : > { %1415 = vmatpush.bf16.msrb.mxu2 %v1957_v34 }
  0xd8   : > { %v440_v42 = vpop.f32.mrf.mxu0 }
  0xd9   : > { %v469_v43 = vmul.f32 %v440_v42, %v440_v42  ;;  %v459_v44 = vpop.f32.mrf.mxu1 }
  0xda   : > { %v473_v45 = vmul.f32 %v459_v44, %v459_v44 }
  0xdc   : > { %v477_v47 = vadd.f32 %v473_v45, %v469_v43 }
  0xde   : > { %v1961_v48 = vmax.f32 %v477_v47, 1e-10 }
  0xe0   : > { %v442_v50 = vpop.f32.mrf.mxu0  ;;  %1516 = vrsqrt.f32 %v1961_v48  ;;  %vm492_vm0 = vcmp.eq.f32.partialorder %v1961_v48, inf  ;;  %vm494_vm1 = vcmp.eq.f32.partialorder %v1961_v48, 0.0  ;;  %v495_v35 = vand.u32 2147483648, %v1961_v48 }
  0xe1   : > { %v470_v51 = vmul.f32 %v442_v50, %v442_v50  ;;  %v461_v52 = vpop.f32.mrf.mxu1 }
  0xe2   : > { %v474_v53 = vmul.f32 %v461_v52, %v461_v52 }
  0xe4   : > { %v478_v55 = vadd.f32 %v474_v53, %v470_v51  ;;  %v751_v17 = vpop.f32.mrf.mxu3 }
  0xe5   : > { %v780_v25 = vmul.f32 %v751_v17, %v751_v17 }
  0xe6   : > { %v1517_v56 = vpop.eup %1516  ;;  %v1966_v57 = vmax.f32 %v478_v55, 1e-10 }
  0xe7   : > { %v486_v59 = vmul.f32 %v1517_v56, %v1961_v48 }
  0xe8   : > { %v445_v60 = vpop.f32.mrf.mxu0  ;;  %1518 = vrsqrt.f32 %v1966_v57  ;;  %vm504_vm2 = vcmp.eq.f32.partialorder %v1966_v57, inf  ;;  %v507_v36 = vand.u32 2147483648, %v1966_v57  ;;  %vm506_vm3 = vcmp.eq.f32.partialorder %v1966_v57, 0.0 }
  0xe9   : > { %v471_v62 = vmul.f32 %v445_v60, %v445_v60  ;;  %v464_v63 = vpop.f32.mrf.mxu1  ;;  %v487_v0 = vmul.f32 %v1517_v56, %v486_v59 }
  0xea   : > { %v475_v1 = vmul.f32 %v464_v63, %v464_v63 }
  0xeb   : > { %v488_v2 = vmul.f32 0.5, %v487_v0 }
  0xec   : > { %v479_v3 = vadd.f32 %v475_v1, %v471_v62  ;;  %v753_v42 = vpop.f32.mrf.mxu3 }
  0xed   : > { %v489_v4 = vsub.f32 1.5, %v488_v2  ;;  %v781_v46 = vmul.f32 %v753_v42, %v753_v42 }
  0xee   : > { %v1519_v5 = vpop.eup %1518  ;;  %v1972_v6 = vmax.f32 %v479_v3, 1e-10 }
  0xef   : > { %v498_v8 = vmul.f32 %v1519_v5, %v1966_v57  ;;  %v490_v14 = vmul.f32 %v1517_v56, %v489_v4 }
  0xf0   : > { %v447_v10 = vpop.f32.mrf.mxu0  ;;  %1520 = vrsqrt.f32 %v1972_v6  ;;  %vm516_vm4 = vcmp.eq.f32.partialorder %v1972_v6, inf  ;;  %v519_v63 = vand.u32 2147483648, %v1972_v6  ;;  %vm518_vm6 = vcmp.eq.f32.partialorder %v1972_v6, 0.0 }
  0xf1   : > { %v472_v12 = vmul.f32 %v447_v10, %v447_v10  ;;  %v466_v13 = vpop.f32.mrf.mxu1  ;;  %v499_v15 = vmul.f32 %v1519_v5, %v498_v8  ;;  %v491_v21 = vmul.f32 %v490_v14, %v1961_v48 }
  0xf2   : > { %v476_v16 = vmul.f32 %v466_v13, %v466_v13 }
  0xf3   : > { %v500_v18 = vmul.f32 0.5, %v499_v15  ;;  %v493_v32 = vsel %vm492_vm0, %v1961_v48, %v491_v21 }
  0xf4   : > { %v480_v19 = vadd.f32 %v476_v16, %v472_v12  ;;  %v496_v40 = vsel %vm494_vm1, %v495_v35, %v493_v32  ;;  %v756_v32 = vpop.f32.mrf.mxu3 }
  0xf5   : > { %v501_v22 = vsub.f32 1.5, %v500_v18 }
  0xf6   : > { %v1521_v23 = vpop.eup %1520  ;;  %v1983_v24 = vmax.f32 %v480_v19, 1e-10 }
  0xf7   : > { %v502_v26 = vmul.f32 %v1519_v5, %v501_v22  ;;  %v510_v27 = vmul.f32 %v1521_v23, %v1972_v6 }
  0xf8   : > { %v770_v28 = vpop.f32.mrf.mxu0  ;;  %1522 = vrsqrt.f32 %v1983_v24  ;;  %vm528_vm5 = vcmp.eq.f32.partialorder %v1983_v24, inf  ;;  %v531_v0 = vand.u32 2147483648, %v1983_v24  ;;  %vm530_vm7 = vcmp.eq.f32.partialorder %v1983_v24, 0.0 }
  0xf9   : > { %v784_v30 = vmul.f32 %v770_v28, %v770_v28  ;;  %v503_v31 = vmul.f32 %v502_v26, %v1966_v57  ;;  %v511_v33 = vmul.f32 %v1521_v23, %v510_v27 }
  0xfb   : > { %v788_v37 = vadd.f32 %v784_v30, %v780_v25  ;;  %v505_v38 = vsel %vm504_vm2, %v1966_v57, %v503_v31  ;;  %v512_v39 = vmul.f32 0.5, %v511_v33  ;;  %v782_v33 = vmul.f32 %v756_v32, %v756_v32 }
  0xfc   : > { %v508_v41 = vsel %vm506_vm3, %v507_v36, %v505_v38  ;;  %v758_v42 = vpop.f32.mrf.mxu3 }
  0xfd   : > { %v792_v34 = vmax.f32 %v788_v37, 1e-10  ;;  %v537_v43 = vpack.c.bf16 %v508_v41, %v496_v40  ;;  %v513_v44 = vsub.f32 1.5, %v512_v39 }
  0xfe   : > { %v1523_v45 = vpop.eup %1522 }
  0xff   : > { %1524 = vrsqrt.f32 %v792_v34  ;;  %611 = vmatmul.bf16.vlgmr.msra.gmra.mxu2 %v537_v43  ;;  %v522_v47 = vmul.f32 %v1523_v45, %v1983_v24  ;;  %v514_v50 = vmul.f32 %v1521_v23, %v513_v44  ;;  %vm803_vm8 = vcmp.eq.f32.partialorder %v792_v34, inf }
 0x100   : > { %v772_v48 = vpop.f32.mrf.mxu0  ;;  %v806_v16 = vand.u32 2147483648, %v792_v34  ;;  %vm805_vm9 = vcmp.eq.f32.partialorder %v792_v34, 0.0 }
 0x101   : > { %v785_v49 = vmul.f32 %v772_v48, %v772_v48  ;;  %v523_v51 = vmul.f32 %v1523_v45, %v522_v47  ;;  %v515_v56 = vmul.f32 %v514_v50, %v1972_v6 }
 0x103   : > { %v789_v52 = vadd.f32 %v785_v49, %v781_v46  ;;  %v524_v53 = vmul.f32 0.5, %v523_v51  ;;  %v517_v61 = vsel %vm516_vm4, %v1972_v6, %v515_v56  ;;  %v783_v46 = vmul.f32 %v758_v42, %v758_v42 }
 0x104   : > { %v520_v3 = vsel %vm518_vm6, %v519_v63, %v517_v61 }
 0x105   : > { %v1525_v54 = vpop.eup %1524  ;;  %v793_v55 = vmax.f32 %v789_v52, 1e-10  ;;  %v525_v57 = vsub.f32 1.5, %v524_v53 }
 0x106   : > { %v797_v58 = vmul.f32 %v1525_v54, %v792_v34 }
 0x107   : > { %1526 = vrsqrt.f32 %v793_v55  ;;  %v526_v59 = vmul.f32 %v1523_v45, %v525_v57  ;;  %vm815_vm10 = vcmp.eq.f32.partialorder %v793_v55, inf  ;;  %v818_v18 = vand.u32 2147483648, %v793_v55 }
 0x108   : > { %v798_v60 = vmul.f32 %v1525_v54, %v797_v58  ;;  %vm817_vm11 = vcmp.eq.f32.partialorder %v793_v55, 0.0 }
 0x109   : > { %v527_v62 = vmul.f32 %v526_v59, %v1983_v24 }
 0x10a   : > { %v799_v1 = vmul.f32 0.5, %v798_v60 }
 0x10b   : > { %v529_v2 = vsel %vm528_vm5, %v1983_v24, %v527_v62 }
 0x10c   : > { %v532_v4 = vsel %vm530_vm7, %v531_v0, %v529_v2  ;;  %v800_v5 = vsub.f32 1.5, %v799_v1 }
 0x10d   : > { %v1527_v7 = vpop.eup %1526  ;;  %v538_v8 = vpack.c.bf16 %v532_v4, %v520_v3 }
 0x10e   : > { %v801_v10 = vmul.f32 %v1525_v54, %v800_v5  ;;  %v809_v11 = vmul.f32 %v1527_v7, %v793_v55 }
 0x10f   : > { %616 = vmatmul.bf16.gmra.mxu2 %v538_v8 }
 0x110   : > { %v810_v12 = vmul.f32 %v1527_v7, %v809_v11  ;;  %v802_v13 = vmul.f32 %v801_v10, %v792_v34 }
 0x112   : > { %v811_v14 = vmul.f32 0.5, %v810_v12  ;;  %v804_v17 = vsel %vm803_vm8, %v792_v34, %v802_v13 }
 0x113   : > { %v807_v20 = vsel %vm805_vm9, %v806_v16, %v804_v17 }
 0x114   : > { %v812_v15 = vsub.f32 1.5, %v811_v14 }
 0x116   : > { %v813_v6 = vmul.f32 %v1527_v7, %v812_v15 }
 0x118   : > { %v814_v19 = vmul.f32 %v813_v6, %v793_v55 }
 0x11a   : > { %v816_v21 = vsel %vm815_vm10, %v793_v55, %v814_v19 }
 0x11b   : > { %v819_v22 = vsel %vm817_vm11, %v818_v18, %v816_v21 }
 0x11c   : > { %v848_v23 = vpack.c.bf16 %v819_v22, %v807_v20 }
 0x11e   : > { %922 = vmatmul.bf16.vlgmr.msrb.gmra.mxu1 %v848_v23 }
 0x11f   : > { %774 = vmatmul.bf16.vlgmr.msrb.gmra.mxu2 %v1976_v9 }
 0x182   : > { %v612_v24 = vpop.f32.mrf.mxu2 }
 0x183   : > { %v948_v30 = vmax.f32 %v612_v24, 1e-10 }
 0x18a   : > { %v614_v25 = vpop.f32.mrf.mxu2 }
 0x18b   : > { %v949_v31 = vmax.f32 %v614_v25, 1e-10 }
 0x192   : > { %v2009_v26 = vpop.f32.mrf.mxu2 }
 0x193   : > { %v950_v17 = vmax.f32 %v2009_v26, 1e-10 }
 0x19a   : > { %v2011_v27 = vpop.f32.mrf.mxu2 }
 0x19b   : > { %v923_v28 = vpop.f32.mrf.mxu1  ;;  %v951_v19 = vmax.f32 %v2011_v27, 1e-10 }
 0x19c   : > { %v964_v29 = vmax.f32 %v923_v28, 1e-10 }
 0x19e   : > { %1528 = vlog2.f32 %v964_v29 }
 0x19f   : > { %1530 = vlog2.f32 %v948_v30 }
 0x1a0   : > { %1532 = vlog2.f32 %v949_v31 }
 0x1a2   : > { %v775_v35 = vpop.f32.mrf.mxu2 }
 0x1a3   : > { %v786_v36 = vmul.f32 %v775_v35, %v775_v35  ;;  %v925_v37 = vpop.f32.mrf.mxu1 }
 0x1a4   : > { %v965_v38 = vmax.f32 %v925_v37, 1e-10  ;;  %v1529_v39 = vpop.eup %1528 }
 0x1a5   : > { %v790_v9 = vadd.f32 %v786_v36, %v782_v33  ;;  %v1531_v41 = vpop.eup %1530  ;;  %v969_v34 = vmul.f32 0.6931472, %v1529_v39 }
 0x1a6   : > { %1534 = vlog2.f32 %v965_v38  ;;  %v1533_v43 = vpop.eup %1532  ;;  %v953_v45 = vmul.f32 0.6931472, %v1531_v41 }
 0x1a7   : > { %v794_v40 = vmax.f32 %v790_v9, 1e-10  ;;  %v955_v49 = vmul.f32 0.6931472, %v1533_v43 }
 0x1a8   : > { %v976_v50 = vsub.f32 %v953_v45, %v969_v34 }
 0x1a9   : > { %1536 = vrsqrt.f32 %v794_v40  ;;  %vm827_vm12 = vcmp.eq.f32.partialorder %v794_v40, inf  ;;  %v830_v11 = vand.u32 2147483648, %v794_v40  ;;  %vm829_vm14 = vcmp.eq.f32.partialorder %v794_v40, 0.0 }
 0x1aa   : > { %v777_v44 = vpop.f32.mrf.mxu2  ;;  %v980_v57 = vand.u32 2147483647, %v976_v50 }
 0x1ab   : > { %v787_v47 = vmul.f32 %v777_v44, %v777_v44 }
 0x1ac   : > { %v1535_v48 = vpop.eup %1534 }
 0x1ad   : > { %v971_v51 = vmul.f32 0.6931472, %v1535_v48  ;;  %v791_v52 = vadd.f32 %v787_v47, %v783_v46 }
 0x1af   : > { %v1537_v53 = vpop.eup %1536  ;;  %v977_v54 = vsub.f32 %v955_v49, %v971_v51  ;;  %v795_v55 = vmax.f32 %v791_v52, 1e-10 }
 0x1b0   : > { %v821_v56 = vmul.f32 %v1537_v53, %v794_v40 }
 0x1b1   : > { %v981_v58 = vand.u32 2147483647, %v977_v54  ;;  %1538 = vrsqrt.f32 %v795_v55  ;;  %vm839_vm13 = vcmp.eq.f32.partialorder %v795_v55, inf  ;;  %v842_v12 = vand.u32 2147483648, %v795_v55 }
 0x1b2   : > { %v822_v59 = vmul.f32 %v1537_v53, %v821_v56  ;;  %vm841_vm15 = vcmp.eq.f32.partialorder %v795_v55, 0.0  ;;  %1540 = vlog2.f32 %v950_v17 }
 0x1b3   : > { %v984_v60 = vadd.f32 %v981_v58, %v980_v57 }
 0x1b4   : > { %v823_v61 = vmul.f32 0.5, %v822_v59 }
 0x1b6   : > { %v824_v62 = vsub.f32 1.5, %v823_v61 }
 0x1b7   : > { %v1539_v63 = vpop.eup %1538 }
 0x1b8   : > { %v833_v0 = vmul.f32 %v1539_v63, %v795_v55  ;;  %v825_v1 = vmul.f32 %v1537_v53, %v824_v62  ;;  %v1541_v20 = vpop.eup %1540 }
 0x1b9   : > { %v957_v24 = vmul.f32 0.6931472, %v1541_v20 }
 0x1ba   : > { %v834_v2 = vmul.f32 %v1539_v63, %v833_v0  ;;  %v826_v4 = vmul.f32 %v825_v1, %v794_v40 }
 0x1bc   : > { %v835_v3 = vmul.f32 0.5, %v834_v2  ;;  %v828_v8 = vsel %vm827_vm12, %v794_v40, %v826_v4 }
 0x1bd   : > { %v831_v14 = vsel %vm829_vm14, %v830_v11, %v828_v8 }
 0x1be   : > { %v836_v5 = vsub.f32 1.5, %v835_v3 }
 0x1c0   : > { %v837_v7 = vmul.f32 %v1539_v63, %v836_v5 }
 0x1c2   : > { %v838_v10 = vmul.f32 %v837_v7, %v795_v55 }
 0x1c4   : > { %v840_v13 = vsel %vm839_vm13, %v795_v55, %v838_v10 }
 0x1c5   : > { %v843_v15 = vsel %vm841_vm15, %v842_v12, %v840_v13 }
 0x1c6   : > { %v849_v16 = vpack.c.bf16 %v843_v15, %v831_v14 }
 0x1c8   : > { %927 = vmatmul.bf16.vlgmr.msrb.gmra.mxu3 %v849_v16 }
 0x24b   : > { %v928_v6 = vpop.f32.mrf.mxu3 }
 0x24c   : > { %v966_v18 = vmax.f32 %v928_v6, 1e-10 }
 0x24e   : > { %1542 = vlog2.f32 %v966_v18 }
 0x24f   : > { %1544 = vlog2.f32 %v951_v19 }
 0x253   : > { %v930_v21 = vpop.f32.mrf.mxu3 }
 0x254   : > { %v1543_v22 = vpop.eup %1542  ;;  %v967_v23 = vmax.f32 %v930_v21, 1e-10 }
 0x255   : > { %v973_v25 = vmul.f32 0.6931472, %v1543_v22  ;;  %v1545_v30 = vpop.eup %1544 }
 0x256   : > { %1546 = vlog2.f32 %v967_v23  ;;  %v959_v31 = vmul.f32 0.6931472, %v1545_v30 }
 0x257   : > { %v978_v28 = vsub.f32 %v957_v24, %v973_v25 }
 0x259   : > { %v982_v29 = vand.u32 2147483647, %v978_v28 }
 0x25b   : > { %v985_v26 = vadd.f32 %v984_v60, %v982_v29 }
 0x25c   : > { %v1547_v32 = vpop.eup %1546 }
 0x25d   : > { %v975_v33 = vmul.f32 0.6931472, %v1547_v32 }
 0x25f   : > { %v979_v27 = vsub.f32 %v959_v31, %v975_v33 }
 0x261   : > { %v983_v35 = vand.u32 2147483647, %v979_v27 }
 0x263   : > { %v986_v36 = vadd.f32 %v985_v26, %v983_v35 }
 0x265   : > { %987 = vst [vmem:[%s304_s5] sm:$0xff] %v986_v36 }
 0x266   : > { %1695 = shalt.err (!%p1692_p0)
}
 0x267   : > { %1436 = dma.vmem_to_hbm [thread:$0]  (%p1877_p7), %s1002_s6, 128, %s1004_s10, %s989_s11  }
 0x268 PF: > { %s1015_s2 = sand.u32 1, %s1742_s15   ;;  %p1453_p3 = pnand %p1129_p11, %p1840_p6 }
 0x269   : > { %s1016_s13 = scalar_lea.sflag [#allocation6], %s1015_s2 }
 0x26a   : > { %p1454_p5 = pneg %p1453_p3 }
 0x26c   : > { %1737 = dma.done.wait (%p1454_p5), %s1016_s13, 128  }
 0x26d   : > { %1739 = vsyncadd (%p1454_p5), %s1016_s13, 4294967168  ;;  %s24_s20 = sadd.s32 1, %s1762_s20   ;;  %s2079_s19 = sld [smem:[#allocation20_spill]] }
 0x26e   : > { %p21_p9 = scmp.ge.s32.totalorder %s24_s20, 4   ;;  %s2080_s18 = sld [smem:[#allocation18_spill]] }
 0x26f   : > { %s2081_s26 = sld [smem:[#allocation19_spill]]  ;;  %s2082_s15 = smov %s1746_s16 }
 0x270   : > { %s2083_s16 = smov %s1750_s17 }
 0x271   :  { %23 = sbr.rel (!%p21_p9) target bundleno = 12 (0xc), region = 110 }
 0x273   : > { %s2084_s17 = smov %s2079_s19 }
 0x275   : > { %s2085_s19 = smov %s2081_s26 }
 0x276   :  { %1022 = vsyncpa [#allocation5], 1 }
 0x277   :  { %1024 = vsyncpa [#allocation5 + $0x1], 1 }
 0x278   :  { %1025 = vsyncpa [#allocation8], 1 }
 0x279   :  { %1027 = vsyncpa [#allocation8 + $0x1], 1 }
 0x27a   :  { %1028 = vsyncpa [#allocation11], 1 }
 0x27b   :  { %1029 = vsyncpa [#allocation6], 1 }
 0x27c   :  { %1031 = vsyncpa [#allocation6 + $0x1], 1 }

</bundles_post_ra>
